<compile_context>
chip_gen: v7x
topology: tpu7x:2x2x1
jax: 0.10.0
libtpu: 0.0.40
codegen_flags: <defaults>
</compile_context>

<pallas_src>
import jax
import jax.numpy as jnp
from jax.experimental import pallas as pl
from jax.experimental.pallas import tpu as pltpu

_EPS = 2.220446049250313e-16   # sys.float_info.epsilon, as used by the torch code
_LANE = 256                    # lane-dense last dim (multiple of 128)
_STREAM_TILE_BYTES = 4 << 20   # streaming block size per input per buffer


def _vmem_caps():
    """Returns (physical VMEM bytes, byte budget for our pipelined buffers)."""
    try:
        cap = int(getattr(pltpu.get_tpu_info(), "vmem_capacity_bytes", 0))
    except Exception:
        cap = 0
    if cap <= 0:
        cap = 64 << 20                                  # conservative (v7x per-TC)
    budget = max(4 << 20, min(cap * 2 // 5, 48 << 20))  # <=40% of VMEM for buffers
    return cap, budget


def kld_loss(inp, trg, *, _force_tile_rows=None):
    """Pallas equivalent of KLDLoss().forward(inp, trg); returns a scalar."""
    assert inp.shape == trg.shape, "KLDLoss expects matching shapes"
    total = int(inp.size)
    assert total > 0

    inp_f = inp.reshape(-1)
    trg_f = trg.reshape(-1)
    if total % _LANE != 0:
        # TODO(synk): lane-tail masking in-kernel would avoid this copy; it is
        # only hit when numel is not a multiple of 256 (zero rows/cols are
        # exact no-ops for both the sums and the KLD terms).
        pad = _LANE - total % _LANE
        inp_f = jnp.pad(inp_f, (0, pad))
        trg_f = jnp.pad(trg_f, (0, pad))
    rows = inp_f.size // _LANE
    inp2d = inp_f.reshape(rows, _LANE)        # free reshape (contiguous)
    trg2d = trg_f.reshape(rows, _LANE)

    itemsize = max(jnp.dtype(inp.dtype).itemsize, jnp.dtype(trg.dtype).itemsize)
    cap, budget = _vmem_caps()
    per_buf_cap = budget // 4                 # 2 inputs x double buffer
    array_bytes = rows * _LANE * itemsize

    # --- choose tiling --------------------------------------------------
    single_tile = (_force_tile_rows is None) and (array_bytes <= per_buf_cap)
    if not single_tile:
        if _force_tile_rows is not None:
            tile_rows = max(8, (min(_force_tile_rows, rows) // 8) * 8)
        else:
            stream_cap = min(per_buf_cap, _STREAM_TILE_BYTES)
            tile_rows = max(8, (stream_cap // (_LANE * itemsize)) // 8 * 8)
        if tile_rows >= rows:
            single_tile = True
    if single_tile:
        tile_rows = rows                      # block == full array: one DMA,
        n_tiles = 1                           # reused by phase 1 (no re-read)
        needs_mask = False
    else:
        n_tiles = -(-rows // tile_rows)
        needs_mask = (rows % tile_rows) != 0  # partial last block -> mask stale rows

    block_bytes = tile_rows * _LANE * itemsize
    vmem_limit = min(cap, max(16 << 20, 4 * block_bytes + (8 << 20)))

    # --- kernel ----------------------------------------------------------
    def kernel(inp_ref, trg_ref, out_ref, s_inp_vec, s_trg_vec, kld_vec):
        phase = pl.program_id(0)              # 0: global sums, 1: KLD accumulation
        tile = pl.program_id(1)

        @pl.when((phase == 0) & (tile == 0))
        def _init():
            s_inp_vec[...] = jnp.zeros_like(s_inp_vec)
            s_trg_vec[...] = jnp.zeros_like(s_trg_vec)
            kld_vec[...] = jnp.zeros_like(kld_vec)

        x_inp = inp_ref[...].astype(jnp.float32)
        x_trg = trg_ref[...].astype(jnp.float32)

        if needs_mask:
            ridx = tile * tile_rows + jax.lax.broadcasted_iota(
                jnp.int32, (tile_rows, _LANE), 0)
            valid = ridx < rows
            x_inp = jnp.where(valid, x_inp, 0.0)
            x_trg = jnp.where(valid, x_trg, 0.0)

        @pl.when(phase == 0)
        def _stats():
            # Fused statistics sweep; lane-vector accumulators (VPU row folds).
            s_inp_vec[...] += jnp.sum(x_inp, axis=0, keepdims=True)
            s_trg_vec[...] += jnp.sum(x_trg, axis=0, keepdims=True)

        @pl.when(phase == 1)
        def _kld():
            si = jnp.sum(s_inp_vec[...], keepdims=True)   # (1,1)  Si = sum(inp)
            st = jnp.sum(s_trg_vec[...], keepdims=True)   # (1,1)  St = sum(trg)
            inv_st = 1.0 / st                              # hoisted scalar recip
            ratio_scale = si * inv_st                      # Si / St
            # trg_n * log(eps + trg_n/(inp_n + eps))
            #   == (trg/St) * log(eps + trg*(Si/St) / (inp + eps*Si))
            denom = x_inp + _EPS * si
            r = pl.reciprocal(denom, approx=True)          # one EUP push
            r = r * (2.0 - denom * r)                      # Newton step (VPU) -> f32 acc.
            ratio = (x_trg * ratio_scale) * r
            term = (x_trg * inv_st) * jnp.log(_EPS + ratio)
            kld_vec[...] += jnp.sum(term, axis=0, keepdims=True)

        @pl.when((phase == 1) & (tile == pl.num_programs(1) - 1))
        def _finalize():
            out_ref[...] = jnp.sum(kld_vec[...], keepdims=True)

    out = pl.pallas_call(
        kernel,
        out_shape=jax.ShapeDtypeStruct((1, 1), jnp.float32),
        grid_spec=pltpu.PrefetchScalarGridSpec(
            num_scalar_prefetch=0,
            grid=(2, n_tiles),                       # (phase, tile): tile innermost
            in_specs=[
                pl.BlockSpec((tile_rows, _LANE), lambda p, t: (t, 0)),
                pl.BlockSpec((tile_rows, _LANE), lambda p, t: (t, 0)),
            ],
            out_specs=pl.BlockSpec((1, 1), lambda p, t: (0, 0)),
            scratch_shapes=[
                pltpu.VMEM((1, _LANE), jnp.float32),   # sum(inp) lane partials
                pltpu.VMEM((1, _LANE), jnp.float32),   # sum(trg) lane partials
                pltpu.VMEM((1, _LANE), jnp.float32),   # KLD lane partials
            ],
        ),
        compiler_params=pltpu.CompilerParams(
            dimension_semantics=("arbitrary", "arbitrary"),
            vmem_limit_bytes=int(vmem_limit),
        ),
    )(inp2d, trg2d)
    return out[0, 0]


def _kld_ref(inp, trg):
    """Pure-JAX reference mirroring the torch KLD formula."""
    inp = inp.astype(jnp.float32)
    trg = trg.astype(jnp.float32)
    inp_n = inp / jnp.sum(inp)
    trg_n = trg / jnp.sum(trg)
    return jnp.sum(trg_n * jnp.log(_EPS + trg_n / (inp_n + _EPS)))


if __name__ == "__main__":
    key = jax.random.PRNGKey(0)
    k1, k2, k3, k4 = jax.random.split(key, 4)

    def _check(loss, ref):
        assert bool(jnp.isfinite(loss)), "non-finite loss"
        assert abs(float(loss) - float(ref)) <= 1e-4 * max(1.0, abs(float(ref))), (
            float(loss), float(ref))

    # 1) Typical small density maps (single-tile path: each input DMA'd once,
    #    phase 1 reuses the resident VMEM block).
    N, C, H, W = 2, 4, 16, 16
    inp = jax.random.uniform(k1, (N, C, H, W), jnp.float32)
    trg = jax.random.uniform(k2, (N, C, H, W), jnp.float32)
    loss = kld_loss(inp, trg)
    jax.block_until_ready(loss)
    _check(loss, _kld_ref(inp, trg))

    # 2) Exercise the multi-tile streaming path + partial-last-tile masking
    #    (rows=40 with forced 16-row tiles -> 3 tiles, masked tail).
    inp2 = jax.random.uniform(k3, (2, 4, 40, 32), jnp.float32)
    trg2 = jax.random.uniform(k4, (2, 4, 40, 32), jnp.float32)
    loss2 = kld_loss(inp2, trg2, _force_tile_rows=16)
    jax.block_until_ready(loss2)
    _check(loss2, _kld_ref(inp2, trg2))

    # 3) bf16 streaming (halves HBM bytes; kernel casts to f32 internally).
    loss3 = kld_loss(inp.astype(jnp.bfloat16), trg.astype(jnp.bfloat16))
    jax.block_until_ready(loss3)
    _check(loss3, _kld_ref(inp.astype(jnp.bfloat16), trg.astype(jnp.bfloat16)))

    # NOTE: zero-sum inputs produce NaN/Inf, matching the unguarded torch code.
    print("KERNEL_OK")
</pallas_src>

<mosaic_0001>
module attributes {stable_mosaic.version = 11 : i64} {
  func.func @kernel(%arg0: i32, %arg1: i32, %arg2: memref<8x256xf32, #tpu.memory_space<vmem>>, %arg3: memref<8x256xf32, #tpu.memory_space<vmem>>, %arg4: memref<1x1xf32, #tpu.memory_space<vmem>>, %arg5: memref<1x256xf32, #tpu.memory_space<vmem>>, %arg6: memref<1x256xf32, #tpu.memory_space<vmem>>, %arg7: memref<1x256xf32, #tpu.memory_space<vmem>>) attributes {dimension_semantics = [#tpu.dimension_semantics<arbitrary>, #tpu.dimension_semantics<arbitrary>], iteration_bounds = array<i64: 2, 1>, scalar_prefetch = 0 : i64, scratch_operands = 3 : i64, tpu.core_type = #tpu.core_type<tc>, window_params = [{transform_indices = @transform_0, window_bounds = array<i64: 8, 256>}, {transform_indices = @transform_1, window_bounds = array<i64: 8, 256>}, {pipeline_mode = #tpu.pipeline_mode<synchronous>, transform_indices = @transform_2, window_bounds = array<i64: 1, 1>}]} {
    %c0_i32 = arith.constant 0 : i32
    %0 = arith.cmpi eq, %arg0, %c0_i32 : i32
    %c0_i32_0 = arith.constant 0 : i32
    %1 = arith.cmpi eq, %arg1, %c0_i32_0 : i32
    %2 = arith.andi %0, %1 : i1
    %3 = arith.extui %2 : i1 to i32
    %c0_i32_1 = arith.constant 0 : i32
    %4 = arith.cmpi ne, %3, %c0_i32_1 : i32
    scf.if %4 {
      %cst = arith.constant 0.000000e+00 : f32
      %18 = vector.broadcast %cst : f32 to vector<1x256xf32>
      %c0_11 = arith.constant 0 : index
      %c0_12 = arith.constant 0 : index
      %19 = vector.load %arg5[%c0_11, %c0_12] : memref<1x256xf32, #tpu.memory_space<vmem>>, vector<1x256xf32>
      tpu.vector_store %arg5[%c0_11, %c0_12], %18 {strides = array<i32>} : memref<1x256xf32, #tpu.memory_space<vmem>>, vector<1x256xf32>,
      %cst_13 = arith.constant 0.000000e+00 : f32
      %20 = vector.broadcast %cst_13 : f32 to vector<1x256xf32>
      %c0_14 = arith.constant 0 : index
      %c0_15 = arith.constant 0 : index
      %21 = vector.load %arg6[%c0_14, %c0_15] : memref<1x256xf32, #tpu.memory_space<vmem>>, vector<1x256xf32>
      tpu.vector_store %arg6[%c0_14, %c0_15], %20 {strides = array<i32>} : memref<1x256xf32, #tpu.memory_space<vmem>>, vector<1x256xf32>,
      %cst_16 = arith.constant 0.000000e+00 : f32
      %22 = vector.broadcast %cst_16 : f32 to vector<1x256xf32>
      %c0_17 = arith.constant 0 : index
      %c0_18 = arith.constant 0 : index
      %23 = vector.load %arg7[%c0_17, %c0_18] : memref<1x256xf32, #tpu.memory_space<vmem>>, vector<1x256xf32>
      tpu.vector_store %arg7[%c0_17, %c0_18], %22 {strides = array<i32>} : memref<1x256xf32, #tpu.memory_space<vmem>>, vector<1x256xf32>,
    } else {
    }
    %c0 = arith.constant 0 : index
    %c0_2 = arith.constant 0 : index
    %5 = vector.load %arg2[%c0, %c0_2] : memref<8x256xf32, #tpu.memory_space<vmem>>, vector<8x256xf32>
    %c0_3 = arith.constant 0 : index
    %c0_4 = arith.constant 0 : index
    %6 = vector.load %arg3[%c0_3, %c0_4] : memref<8x256xf32, #tpu.memory_space<vmem>>, vector<8x256xf32>
    %c0_i32_5 = arith.constant 0 : i32
    %7 = arith.cmpi eq, %arg0, %c0_i32_5 : i32
    %8 = arith.extui %7 : i1 to i32
    %c0_i32_6 = arith.constant 0 : i32
    %9 = arith.cmpi ne, %8, %c0_i32_6 : i32
    scf.if %9 {
      %c0_11 = arith.constant 0 : index
      %c0_12 = arith.constant 0 : index
      %18 = vector.load %arg5[%c0_11, %c0_12] : memref<1x256xf32, #tpu.memory_space<vmem>>, vector<1x256xf32>
      %cst = arith.constant dense<0.000000e+00> : vector<256xf32>
      %19 = vector.multi_reduction <add>, %5, %cst [0] : vector<8x256xf32> to vector<256xf32>
      %20 = vector.shape_cast %19 : vector<256xf32> to vector<1x256xf32>
      %21 = arith.addf %18, %20 : vector<1x256xf32>
      %c0_13 = arith.constant 0 : index
      %c0_14 = arith.constant 0 : index
      %22 = vector.load %arg5[%c0_13, %c0_14] : memref<1x256xf32, #tpu.memory_space<vmem>>, vector<1x256xf32>
      tpu.vector_store %arg5[%c0_13, %c0_14], %21 {strides = array<i32>} : memref<1x256xf32, #tpu.memory_space<vmem>>, vector<1x256xf32>,
      %c0_15 = arith.constant 0 : index
      %c0_16 = arith.constant 0 : index
      %23 = vector.load %arg6[%c0_15, %c0_16] : memref<1x256xf32, #tpu.memory_space<vmem>>, vector<1x256xf32>
      %cst_17 = arith.constant dense<0.000000e+00> : vector<256xf32>
      %24 = vector.multi_reduction <add>, %6, %cst_17 [0] : vector<8x256xf32> to vector<256xf32>
      %25 = vector.shape_cast %24 : vector<256xf32> to vector<1x256xf32>
      %26 = arith.addf %23, %25 : vector<1x256xf32>
      %c0_18 = arith.constant 0 : index
      %c0_19 = arith.constant 0 : index
      %27 = vector.load %arg6[%c0_18, %c0_19] : memref<1x256xf32, #tpu.memory_space<vmem>>, vector<1x256xf32>
      tpu.vector_store %arg6[%c0_18, %c0_19], %26 {strides = array<i32>} : memref<1x256xf32, #tpu.memory_space<vmem>>, vector<1x256xf32>,
    } else {
    }
    %c1_i32 = arith.constant 1 : i32
    %10 = arith.cmpi eq, %arg0, %c1_i32 : i32
    %11 = arith.extui %10 : i1 to i32
    %c0_i32_7 = arith.constant 0 : i32
    %12 = arith.cmpi ne, %11, %c0_i32_7 : i32
    scf.if %12 {
      %c0_11 = arith.constant 0 : index
      %c0_12 = arith.constant 0 : index
      %18 = vector.load %arg5[%c0_11, %c0_12] : memref<1x256xf32, #tpu.memory_space<vmem>>, vector<1x256xf32>
      %19 = vector.shape_cast %18 : vector<1x256xf32> to vector<1x1x256xf32>
      %cst = arith.constant dense<0.000000e+00> : vector<1xf32>
      %20 = vector.multi_reduction <add>, %19, %cst [1, 2] : vector<1x1x256xf32> to vector<1xf32>
      %21 = vector.shape_cast %20 : vector<1xf32> to vector<1x1x1xf32>
      %22 = vector.extract %21[0, 0, 0] : f32 from vector<1x1x1xf32>
      %23 = vector.broadcast %22 : f32 to vector<1x1xf32>
      %c0_13 = arith.constant 0 : index
      %c0_14 = arith.constant 0 : index
      %24 = vector.load %arg6[%c0_13, %c0_14] : memref<1x256xf32, #tpu.memory_space<vmem>>, vector<1x256xf32>
      %25 = vector.shape_cast %24 : vector<1x256xf32> to vector<1x1x256xf32>
      %cst_15 = arith.constant dense<0.000000e+00> : vector<1xf32>
      %26 = vector.multi_reduction <add>, %25, %cst_15 [1, 2] : vector<1x1x256xf32> to vector<1xf32>
      %27 = vector.shape_cast %26 : vector<1xf32> to vector<1x1x1xf32>
      %28 = vector.extract %27[0, 0, 0] : f32 from vector<1x1x1xf32>
      %29 = vector.broadcast %28 : f32 to vector<1x1xf32>
      %cst_16 = arith.constant 1.000000e+00 : f32
      %30 = vector.broadcast %cst_16 : f32 to vector<1x1xf32>
      %31 = arith.divf %30, %29 : vector<1x1xf32>
      %32 = arith.mulf %23, %31 : vector<1x1xf32>
      %cst_17 = arith.constant 2.22044605E-16 : f32
      %33 = vector.broadcast %cst_17 : f32 to vector<1x1xf32>
      %34 = arith.mulf %33, %23 : vector<1x1xf32>
      %35 = vector.broadcast %34 : vector<1x1xf32> to vector<8x256xf32>
      %36 = arith.addf %5, %35 : vector<8x256xf32>
      %37 = tpu.reciprocal %36 {approx = true} : vector<8x256xf32> -> vector<8x256xf32>
      %38 = arith.mulf %36, %37 : vector<8x256xf32>
      %cst_18 = arith.constant 2.000000e+00 : f32
      %39 = vector.broadcast %cst_18 : f32 to vector<8x256xf32>
      %40 = arith.subf %39, %38 : vector<8x256xf32>
      %41 = arith.mulf %37, %40 : vector<8x256xf32>
      %42 = vector.broadcast %32 : vector<1x1xf32> to vector<8x256xf32>
      %43 = arith.mulf %6, %42 : vector<8x256xf32>
      %44 = arith.mulf %43, %41 : vector<8x256xf32>
      %45 = vector.broadcast %31 : vector<1x1xf32> to vector<8x256xf32>
      %46 = arith.mulf %6, %45 : vector<8x256xf32>
      %cst_19 = arith.constant 2.22044605E-16 : f32
      %47 = vector.broadcast %cst_19 : f32 to vector<8x256xf32>
      %48 = arith.addf %47, %44 : vector<8x256xf32>
      %49 = math.log %48 : vector<8x256xf32>
      %50 = arith.mulf %46, %49 : vector<8x256xf32>
      %c0_20 = arith.constant 0 : index
      %c0_21 = arith.constant 0 : index
      %51 = vector.load %arg7[%c0_20, %c0_21] : memref<1x256xf32, #tpu.memory_space<vmem>>, vector<1x256xf32>
      %cst_22 = arith.constant dense<0.000000e+00> : vector<256xf32>
      %52 = vector.multi_reduction <add>, %50, %cst_22 [0] : vector<8x256xf32> to vector<256xf32>
      %53 = vector.shape_cast %52 : vector<256xf32> to vector<1x256xf32>
      %54 = arith.addf %51, %53 : vector<1x256xf32>
      %c0_23 = arith.constant 0 : index
      %c0_24 = arith.constant 0 : index
      %55 = vector.load %arg7[%c0_23, %c0_24] : memref<1x256xf32, #tpu.memory_space<vmem>>, vector<1x256xf32>
      tpu.vector_store %arg7[%c0_23, %c0_24], %54 {strides = array<i32>} : memref<1x256xf32, #tpu.memory_space<vmem>>, vector<1x256xf32>,
    } else {
    }
    %c1_i32_8 = arith.constant 1 : i32
    %13 = arith.cmpi eq, %arg0, %c1_i32_8 : i32
    %c0_i32_9 = arith.constant 0 : i32
    %14 = arith.cmpi eq, %arg1, %c0_i32_9 : i32
    %15 = arith.andi %13, %14 : i1
    %16 = arith.extui %15 : i1 to i32
    %c0_i32_10 = arith.constant 0 : i32
    %17 = arith.cmpi ne, %16, %c0_i32_10 : i32
    scf.if %17 {
      %c0_11 = arith.constant 0 : index
      %c0_12 = arith.constant 0 : index
      %18 = vector.load %arg7[%c0_11, %c0_12] : memref<1x256xf32, #tpu.memory_space<vmem>>, vector<1x256xf32>
      %19 = vector.shape_cast %18 : vector<1x256xf32> to vector<1x1x256xf32>
      %cst = arith.constant dense<0.000000e+00> : vector<1xf32>
      %20 = vector.multi_reduction <add>, %19, %cst [1, 2] : vector<1x1x256xf32> to vector<1xf32>
      %21 = vector.shape_cast %20 : vector<1xf32> to vector<1x1x1xf32>
      %22 = vector.extract %21[0, 0, 0] : f32 from vector<1x1x1xf32>
      %23 = vector.broadcast %22 : f32 to vector<1x1xf32>
      %c0_13 = arith.constant 0 : index
      %c0_14 = arith.constant 0 : index
      %24 = vector.load %arg4[%c0_13, %c0_14] : memref<1x1xf32, #tpu.memory_space<vmem>>, vector<1x1xf32>
      tpu.vector_store %arg4[%c0_13, %c0_14], %23 {strides = array<i32>} : memref<1x1xf32, #tpu.memory_space<vmem>>, vector<1x1xf32>,
    } else {
    }
    return
  }
  func.func @transform_0(%arg0: i32, %arg1: i32) -> (i32, i32) {
    %c0_i32 = arith.constant 0 : i32
    %c0_i32_0 = arith.constant 0 : i32
    return %arg1, %c0_i32 : i32, i32
  }
  func.func @transform_1(%arg0: i32, %arg1: i32) -> (i32, i32) {
    %c0_i32 = arith.constant 0 : i32
    %c0_i32_0 = arith.constant 0 : i32
    return %arg1, %c0_i32 : i32, i32
  }
  func.func @transform_2(%arg0: i32, %arg1: i32) -> (i32, i32) {
    %c0_i32 = arith.constant 0 : i32
    %c0_i32_0 = arith.constant 0 : i32
    %c0_i32_1 = arith.constant 0 : i32
    return %c0_i32, %c0_i32_0 : i32, i32
  }
}

</mosaic_0001>

<bundles_post_ra>
// kernel: tpu_custom_call.1
= control target key start
LH: loop header
LB: loop body
LE: loop exit
PB: predicated region body
PF: predicated region fallthrough
CT: control target
= control target key end

     0   :  { %7 = vsyncpa [#allocation6], 0  ;;  %s872_s0 = inlined_call_operand.hbm [shape: f32[8,256], index: 0, kind: input, shape index: {}]   ;;  %s873_s1 = inlined_call_operand.hbm [shape: f32[8,256], index: 1, kind: input, shape index: {}]   ;;  %s874_s2 = inlined_call_operand.hbm [shape: f32[1,1], index: 2, kind: output, shape index: {}]  }
   0x1   :  { %8 = vsyncpa [#allocation9], 0 }
   0x2   :  { %9 = vsyncpa [#allocation7], 0  ;;  %s702_s9 = smov 0   ;;  %s704_s10 = smov 0  }
   0x3   :  { %s706_s11 = smov 0  }
   0x4 LB: > { %s475_s12 = sadd.s32 4294967295, %s679_s11   ;;  %s27_s13 = sadd.s32 1, %s675_s10  ;;  %s679_s11 = sphi %s706_s11, %s15_s11   ;;  %s675_s10 = sphi %s704_s10, %s885_s10   ;;  %s671_s9 = sphi %s702_s9, %s884_s9  }
   0x5   : > { %p29_p0 = scmp.ge.s32.totalorder %s27_s13, 2  ;;  %p476_p1 = scmp.ge.s32.totalorder %s679_s11, 1 }
   0x6   : > { %p105_p2 = scmp.lt.s32.totalorder %s679_s11, 3  ;;  %p729_p4 = scmp.eq.s32.totalorder %s475_s12, 0 }
   0x7   : > { %s887_s13 = smov (%p29_p0, %s27_s13), 0  ;;  %s681_s16 = smov [#allocation5]  }
   0x8   : > { %p723_p3 = pnand %p476_p1, %p105_p2  ;;  %s121_s17 = sshll.u32 %s681_s16, 4  ;;  %s122_s17 = int_to_ptr.vmem [resolvable:$true] %s121_s17 }
   0x9   : > { %s879_s15 = scalar_select %p729_p4, 1, 0 }
   0xa   : > { %s878_s14 = scalar_select %p723_p3, 1, 0 }
   0xb   : > { %p510_p5 = pneg %p723_p3  ;;  %s682_s18 = smov [#allocation8]  }
   0xc   : > { %s135_s19 = sshll.u32 %s682_s18, 4  ;;  %s563_s23 = scalar_lea.hbm %s872_s0, 256  ;;  %s741_s19 = int_to_ptr.vmem [resolvable:$true] %s135_s19 }
   0xd   : > { %p737_p6 = pnand %p729_p4, %p510_p5  ;;  %p564_p7 = scmp.ne.s32.totalorder %s872_s0, %s563_s23 }
   0xe   : > { %p570_p11 = scmp.lt.u32.totalorder %s563_s23, %s872_s0 }
   0xf   : > { %p565_p8 = pneg %p737_p6 }
  0x11   : > { %p566_p9 = pnand %p565_p8, %p564_p7 }
  0x13   : > { %p567_p10 = pneg %p566_p9 }
  0x15   : > { %p572_p12 = pnand %p570_p11, %p567_p10 }
  0x17   : > { %575 = shalt.err (!%p572_p12)
}
  0x18   : > { %s576_s28 = scalar_lea.vmem %s122_s17, 256  ;;  %p584_p2 = scmp.lt.s32.totalorder %s122_s17, %s122_s17 }
  0x19   : > { %p577_p13 = scmp.ne.s32.totalorder %s122_s17, %s576_s28  ;;  %p585_p5 = scmp.lt.s32.totalorder %s576_s28, %s576_s28 }
  0x1b   : > { %p579_p0 = pnand %p577_p13, %p565_p8  ;;  %p586_p4 = por %p585_p5, %p584_p2 }
  0x1d   : > { %p580_p1 = pneg %p579_p0 }
  0x1f   : > { %p587_p3 = pnand %p586_p4, %p580_p1 }
  0x21   : > { %590 = shalt.err (!%p587_p3)
}
  0x22   : > { %513 = dma.hbm_to_vmem [thread:$0]  (!%p737_p6), %s872_s0, 256, %s122_s17, [#allocation6]  }
  0x23   : > { %s591_s5 = scalar_lea.hbm %s873_s1, 256 }
  0x24   : > { %p592_p7 = scmp.ne.s32.totalorder %s873_s1, %s591_s5  ;;  %p598_p3 = scmp.lt.u32.totalorder %s591_s5, %s873_s1 }
  0x26   : > { %p594_p9 = pnand %p592_p7, %p565_p8 }
  0x28   : > { %p595_p4 = pneg %p594_p9 }
  0x2a   : > { %p600_p10 = pnand %p598_p3, %p595_p4 }
  0x2c   : > { %603 = shalt.err (!%p600_p10)
}
  0x2d   : > { %s604_s17 = scalar_lea.vmem %s741_s19, 256  ;;  %p612_p0 = scmp.lt.s32.totalorder %s741_s19, %s741_s19 }
  0x2e   : > { %p605_p11 = scmp.ne.s32.totalorder %s741_s19, %s604_s17  ;;  %p613_p1 = scmp.lt.s32.totalorder %s604_s17, %s604_s17 }
  0x30   : > { %p607_p12 = pnand %p605_p11, %p565_p8  ;;  %p614_p2 = por %p613_p1, %p612_p0 }
  0x32   : > { %p608_p13 = pneg %p607_p12 }
  0x34   : > { %p615_p5 = pnand %p614_p2, %p608_p13 }
  0x36   : > { %618 = shalt.err (!%p615_p5)
}
  0x37   : > { %516 = dma.hbm_to_vmem [thread:$0]  (!%p737_p6), %s873_s1, 256, %s741_s19, [#allocation9]  }
  0x38   : > { %p881_p7 = scmp.ne.s32.totalorder %s878_s14, 0 }
  0x39   : > { %p882_p9 = scmp.ne.s32.totalorder (!%p881_p7), %s879_s15, 0 }
  0x3a   : > { %148 = sbr.rel (%p881_p7) target bundleno = 622 (0x26e), region = 28 }
  0x41   : > { %658 = dma.done.wait (%p882_p9), [#allocation6], 256  }
  0x42   : > { %660 = vsyncadd (%p882_p9), [#allocation6], 4294967040 }
  0x43   : > { %662 = dma.done.wait (%p882_p9), [#allocation9], 256  }
  0x44   : > { %664 = vsyncadd (%p882_p9), [#allocation9], 4294967040  ;;  %p164_p8 = scmp.eq.s32.totalorder %s671_s9, 0 }
  0x45   : > { %v170_v0 = vlaneseq (%p164_p8)  ;;  %v683_v1 = vmov (%p164_p8), 0.0  }
  0x46   : > { %169 = sbr.rel (!%p164_p8) target bundleno = 77 (0x4d), region = 40 }
  0x47   : > { %vm172_vm0 = vcmp.lt.s32.totalorder (%p164_p8), %v170_v0, 256 }
  0x48   : > { %174 = vst.msk [vmem:[#allocation2] sm:$0x3] (%p164_p8), %vm172_vm0, %v683_v1  ;;  %175 = vst.msk [vmem:[#allocation3] sm:$0x3] (%p164_p8), %vm172_vm0, %v683_v1 }
  0x49   : > { %176 = vst.msk [vmem:[#allocation4] sm:$0x3] (%p164_p8), %vm172_vm0, %v683_v1 }
  0x4d PF: > { %v801_v2 = vld [vmem:[#allocation5] sm:$0xff]  ;;  %v803_v3 = vld [vmem:[#allocation5 + $0x8] sm:$0xff]  ;;  %v805_v4 = vld [vmem:[#allocation8] sm:$0xff]  ;;  %p483_p6 = scmp.ne.s32.totalorder %s671_s9, 0 }
  0x4e   : > { %v807_v5 = vld [vmem:[#allocation8 + $0x8] sm:$0xff]  ;;  %v185_v6 = vrot.slane (!%p483_p6), %v801_v2, 4  ;;  %v191_v7 = vrot.slane (!%p483_p6), %v803_v3, 4  ;;  %v222_v8 = vrot.slane (!%p483_p6), %v805_v4, 4  ;;  %v684_v12 = vmov (!%p483_p6), 1966171168  }
  0x4f   : > { %183 = sbr.rel (%p483_p6) target bundleno = 100 (0x64), region = 44  ;;  %v228_v9 = vrot.slane (!%p483_p6), %v807_v5, 4  ;;  %v201_v13 = vunpack.c.l.s4 (!%p483_p6), %v684_v12  ;;  %v203_v14 = vlaneseq (!%p483_p6)  ;;  %v184_v39 = vld [vmem:[#allocation2] sm:$0x3] (!%p483_p6)  ;;  %v221_v42 = vld [vmem:[#allocation3] sm:$0x3] (!%p483_p6) }
  0x50   : > { %v186_v10 = vadd.f32 (!%p483_p6), %v185_v6, %v801_v2  ;;  %v192_v11 = vadd.f32 (!%p483_p6), %v191_v7, %v803_v3  ;;  %v223_v15 = vadd.f32 (!%p483_p6), %v222_v8, %v805_v4 }
  0x51   : > { %v229_v16 = vadd.f32 (!%p483_p6), %v228_v9, %v807_v5  ;;  %v202_v23 = vunpack.c.0.s8 (!%p483_p6), %v201_v13  ;;  %v204_v24 = vshrl.u32 (!%p483_p6), %v203_v14, 7  ;;  %vm218_vm1 = vcmp.lt.s32.totalorder (!%p483_p6), %v203_v14, 256 }
  0x52   : > { %v187_v17 = vrot.slane (!%p483_p6), %v186_v10, 2  ;;  %v193_v18 = vrot.slane (!%p483_p6), %v192_v11, 2  ;;  %v224_v19 = vrot.slane (!%p483_p6), %v223_v15, 2 }
  0x53   : > { %v230_v20 = vrot.slane (!%p483_p6), %v229_v16, 2  ;;  %v205_v33 = vsub.s32 (!%p483_p6), %v202_v23, %v204_v24 }
  0x54   : > { %v188_v21 = vadd.f32 (!%p483_p6), %v187_v17, %v186_v10  ;;  %v194_v22 = vadd.f32 (!%p483_p6), %v193_v18, %v192_v11  ;;  %v225_v25 = vadd.f32 (!%p483_p6), %v224_v19, %v223_v15 }
  0x55   : > { %v231_v26 = vadd.f32 (!%p483_p6), %v230_v20, %v229_v16 }
  0x56   : > { %v189_v27 = vrot.slane %v188_v21, 1  ;;  %v195_v28 = vrot.slane %v194_v22, 1  ;;  %v226_v29 = vrot.slane %v225_v25, 1 }
  0x57   : > { %v232_v30 = vrot.slane %v231_v26, 1 }
  0x58   : > { %v190_v31 = vadd.f32 %v189_v27, %v188_v21  ;;  %v196_v32 = vadd.f32 %v195_v28, %v194_v22  ;;  %v227_v34 = vadd.f32 %v226_v29, %v225_v25 }
  0x59   : > { %v233_v35 = vadd.f32 %v232_v30, %v231_v26 }
  0x5a   : > { %v199_v36 = vcombine.low %v190_v31, %v196_v32 }
  0x5b   : > { %v236_v37 = vcombine.low %v227_v34, %v233_v35 }
  0x5c   : > { %v206_v38 = vrot.slane %v199_v36, %v205_v33 }
  0x5d   : > { %v243_v40 = vrot.slane %v236_v37, %v205_v33 }
  0x5e   : > { %v213_v41 = vrot.slane %v206_v38, %v205_v33 }
  0x5f   : > { %v250_v43 = vrot.slane %v243_v40, %v205_v33 }
  0x60   : > { %v215_v44 = vadd.f32 %v213_v41, %v184_v39 }
  0x61   : > { %v252_v45 = vadd.f32 %v250_v43, %v221_v42 }
  0x62   : > { %220 = vst.msk [vmem:[#allocation2] sm:$0x3] %vm218_vm1, %v215_v44 }
  0x63   : > { %253 = vst.msk [vmem:[#allocation3] sm:$0x3] %vm218_vm1, %v252_v45 }
  0x64 PF: > { %p254_p4 = scmp.eq.s32.totalorder %s671_s9, 1  ;;  %p484_p3 = scmp.ne.s32.totalorder %s671_s9, 1 }
  0x65   : > { %v260_v46 = vlaneseq (!%p484_p3)  ;;  %vm270_vm2 = vcmask (!%p484_p3), 1040384  }
  0x66   : > { %257 = sbr.rel (%p484_p3) target bundleno = 379 (0x17b), region = 48 }
  0x67   : > { %v821_v47 = vshrl.u32 (!%p484_p3), %v260_v46, 7  ;;  %vm371_vm3 = vcmp.lt.s32.totalorder (!%p484_p3), %v260_v46, 256 }
  0x69   : > { %v258_v48 = vld [vmem:[#allocation2] sm:$0x3] (!%p484_p3)  ;;  %v262_v50 = vsub.s32 (!%p484_p3), 0, %v821_v47  ;;  %v266_v51 = vsub.s32 (!%p484_p3), 1, %v821_v47 }
  0x6a   : > { %v284_v49 = vld [vmem:[#allocation3] sm:$0x3] (!%p484_p3) }
  0x6b   : > { %v263_v52 = vrot.slane (!%p484_p3), %v258_v48, %v262_v50  ;;  %v267_v53 = vrot.slane (!%p484_p3), %v258_v48, %v266_v51  ;;  %v289_v54 = vrot.slane (!%p484_p3), %v284_v49, %v262_v50  ;;  %v293_v55 = vrot.slane (!%p484_p3), %v284_v49, %v266_v51 }
  0x6c   : > { %v685_v48 = vmov (!%p484_p3), 1966171168  }
  0x6d   : > { %v271_v56 = vsel %vm270_vm2, %v263_v52, 0.0  ;;  %v272_v57 = vsel %vm270_vm2, %v267_v53, 0.0  ;;  %v296_v58 = vsel %vm270_vm2, %v289_v54, 0.0  ;;  %v297_v59 = vsel %vm270_vm2, %v293_v55, 0.0 }
  0x6e   : > { %v273_v60 = vadd.f32 %v272_v57, %v271_v56  ;;  %v298_v61 = vadd.f32 %v297_v59, %v296_v58  ;;  %v354_v49 = vunpack.c.l.s4 %v685_v48 }
  0x70   : > { %274 = vadd.xlane.f32.xlu0 %v273_v60  ;;  %v355_v54 = vunpack.c.0.s8 %v354_v49 }
  0x72   : > { %v358_v58 = vsub.s32 %v355_v54, %v821_v47 }
  0x74   : > { %299 = vadd.xlane.f32.xlu0 %v298_v61  ;;  %v337_v61 = vld [vmem:[#allocation4] sm:$0x3] }
  0xfd   : > { %v275_v62 = vpop.xlane.xlu0 %274 }
  0xfe   : > { %v276_v63 = vrot.slane %v275_v62, 4 }
 0x100   : > { %v277_v0 = vadd.f32 %v276_v63, %v275_v62 }
 0x101   : > { %v300_v1 = vpop.xlane.xlu0 %299 }
 0x102   : > { %v278_v6 = vrot.slane %v277_v0, 2  ;;  %v301_v7 = vrot.slane %v300_v1, 4 }
 0x104   : > { %v302_v8 = vadd.f32 %v301_v7, %v300_v1  ;;  %v279_v9 = vadd.f32 %v278_v6, %v277_v0 }
 0x106   : > { %v303_v10 = vrot.slane %v302_v8, 2  ;;  %v280_v11 = vrot.slane %v279_v9, 1 }
 0x108   : > { %v304_v12 = vadd.f32 %v303_v10, %v302_v8  ;;  %v281_v13 = vadd.f32 %v280_v11, %v279_v9 }
 0x10a   : > { %492 = vpush %v281_v13  ;;  %v305_v14 = vrot.slane %v304_v12, 1 }
 0x10c   : > { %v306_v15 = vadd.f32 %v305_v14, %v304_v12 }
 0x10e   : > { %494 = vpush %v306_v15 }
 0x13b   : > { %s493_s14 = spop %492 }
 0x13c   : > { %v283_v16 = vstv %s493_s14 }
 0x13d   : > { %v312_v17 = vmul.f32 2.220446e-16, %v283_v16 }
 0x13f   : > { %v313_v18 = vadd.f32 %v312_v17, %v801_v2  ;;  %v314_v19 = vadd.f32 %v312_v17, %v803_v3  ;;  %s495_s15 = spop %494 }
 0x140   : > { %v308_v20 = vstv %s495_s15 }
 0x141   : > { %553 = vrcp.f32 %v313_v18 }
 0x142   : > { %555 = vrcp.f32 %v314_v19 }
 0x143   : > { %557 = vrcp.f32 %v308_v20 }
 0x14b   : > { %v554_v21 = vpop.eup %553 }
 0x14c   : > { %v556_v22 = vpop.eup %555  ;;  %v317_v23 = vmul.f32 %v554_v21, %v313_v18 }
 0x14d   : > { %v558_v24 = vpop.eup %557  ;;  %v318_v25 = vmul.f32 %v556_v22, %v314_v19 }
 0x14e   : > { %v319_v26 = vsub.f32 2.0, %v317_v23  ;;  %v311_v27 = vmul.f32 %v558_v24, %v283_v16  ;;  %v327_v37 = vmul.f32 %v558_v24, %v805_v4  ;;  %v328_v39 = vmul.f32 %v558_v24, %v807_v5 }
 0x14f   : > { %v320_v28 = vsub.f32 2.0, %v318_v25 }
 0x150   : > { %v321_v29 = vmul.f32 %v554_v21, %v319_v26  ;;  %v323_v30 = vmul.f32 %v311_v27, %v805_v4  ;;  %v324_v2 = vmul.f32 %v311_v27, %v807_v5 }
 0x151   : > { %v322_v31 = vmul.f32 %v556_v22, %v320_v28 }
 0x152   : > { %v325_v3 = vmul.f32 %v323_v30, %v321_v29 }
 0x153   : > { %v326_v32 = vmul.f32 %v324_v2, %v322_v31 }
 0x154   : > { %v329_v33 = vadd.f32 2.220446e-16, %v325_v3 }
 0x155   : > { %v330_v34 = vadd.f32 2.220446e-16, %v326_v32 }
 0x156   : > { %559 = vlog2.f32 %v329_v33 }
 0x157   : > { %561 = vlog2.f32 %v330_v34 }
 0x160   : > { %v560_v35 = vpop.eup %559 }
 0x161   : > { %v562_v36 = vpop.eup %561  ;;  %v332_v38 = vmul.f32 0.6931472, %v560_v35 }
 0x162   : > { %v334_v40 = vmul.f32 0.6931472, %v562_v36 }
 0x163   : > { %v335_v41 = vmul.f32 %v332_v38, %v327_v37 }
 0x164   : > { %v336_v42 = vmul.f32 %v334_v40, %v328_v39 }
 0x165   : > { %v338_v43 = vrot.slane %v335_v41, 4 }
 0x166   : > { %v344_v44 = vrot.slane %v336_v42, 4 }
 0x167   : > { %v339_v45 = vadd.f32 %v338_v43, %v335_v41 }
 0x168   : > { %v345_v50 = vadd.f32 %v344_v44, %v336_v42 }
 0x169   : > { %v340_v51 = vrot.slane %v339_v45, 2 }
 0x16a   : > { %v346_v52 = vrot.slane %v345_v50, 2 }
 0x16b   : > { %v341_v53 = vadd.f32 %v340_v51, %v339_v45 }
 0x16c   : > { %v347_v55 = vadd.f32 %v346_v52, %v345_v50 }
 0x16d   : > { %v342_v56 = vrot.slane %v341_v53, 1 }
 0x16e   : > { %v348_v57 = vrot.slane %v347_v55, 1 }
 0x16f   : > { %v343_v4 = vadd.f32 %v342_v56, %v341_v53 }
 0x170   : > { %v349_v5 = vadd.f32 %v348_v57, %v347_v55 }
 0x172   : > { %v352_v59 = vcombine.low %v343_v4, %v349_v5 }
 0x174   : > { %v359_v60 = vrot.slane %v352_v59, %v358_v58 }
 0x176   : > { %v366_v62 = vrot.slane %v359_v60, %v358_v58 }
 0x178   : > { %v368_v63 = vadd.f32 %v366_v62, %v337_v61 }
 0x17a   : > { %373 = vst.msk [vmem:[#allocation4] sm:$0x3] %vm371_vm3, %v368_v63 }
 0x17b PF: > { %377 = sbr.rel (!%p254_p4) target bundleno = 597 (0x255), region = 52  ;;  %v380_v0 = vlaneseq (%p254_p4)  ;;  %vm390_vm4 = vcmask (%p254_p4), 1040384   ;;  %vm404_vm5 = vcmask (%p254_p4), 0  }
 0x17d   : > { %v381_v1 = vshrl.u32 (%p254_p4), %v380_v0, 7 }
 0x17f   : > { %v382_v7 = vsub.s32 (%p254_p4), 0, %v381_v1  ;;  %v386_v8 = vsub.s32 (%p254_p4), 1, %v381_v1 }
 0x181   : > { %v378_v6 = vld [vmem:[#allocation4] sm:$0x3] (%p254_p4) }
 0x182   : > { %v383_v47 = vrot.slane %v378_v6, %v382_v7  ;;  %v387_v9 = vrot.slane %v378_v6, %v386_v8 }
 0x184   : > { %v391_v10 = vsel %vm390_vm4, %v383_v47, 0.0  ;;  %v392_v11 = vsel %vm390_vm4, %v387_v9, 0.0 }
 0x185   : > { %v393_v12 = vadd.f32 %v392_v11, %v391_v10 }
 0x187   : > { %394 = vadd.xlane.f32.xlu0 %v393_v12 }
 0x214   : > { %v395_v13 = vpop.xlane.xlu0 %394 }
 0x215   : > { %v396_v46 = vrot.slane %v395_v13, 4 }
 0x217   : > { %v397_v14 = vadd.f32 %v396_v46, %v395_v13 }
 0x219   : > { %v398_v15 = vrot.slane %v397_v14, 2 }
 0x21b   : > { %v399_v16 = vadd.f32 %v398_v15, %v397_v14 }
 0x21d   : > { %v400_v17 = vrot.slane %v399_v16, 1 }
 0x21f   : > { %v401_v18 = vadd.f32 %v400_v17, %v399_v16 }
 0x221   : > { %496 = vpush %v401_v18 }
 0x252   : > { %s497_s9 = spop %496 }
 0x253   : > { %v403_v19 = vstv %s497_s9 }
 0x254   : > { %405 = vst.msk [vmem:[#allocation10] sm:$0x1] %vm404_vm5, %v403_v19 }
 0x255 PF: > { %p837_p10 = scmp.eq.s32.totalorder %s475_s12, 1  ;;  %s686_s20 = smov [#allocation10]  }
 0x256   : > { %s413_s22 = sshll.u32 %s686_s20, 4  ;;  %s414_s22 = int_to_ptr.vmem [resolvable:$true] %s413_s22 }
 0x257   : > { %s619_s23 = scalar_lea.vmem %s414_s22, 16  ;;  %s625_s24 = scalar_lea.vmem %s414_s22, 32 }
 0x258   : > { %p620_p11 = scmp.ne.s32.totalorder %s414_s22, %s619_s23  ;;  %p626_p0 = scmp.lt.s32.totalorder %s414_s22, %s414_s22 }
 0x259   : > { %p627_p1 = scmp.lt.s32.totalorder %s625_s24, %s619_s23 }
 0x25a   : > { %p621_p12 = pnand %p620_p11, %p837_p10 }
 0x25b   : > { %p628_p2 = por %p627_p1, %p626_p0 }
 0x25c   : > { %p622_p13 = pneg %p621_p12 }
 0x25e   : > { %p629_p5 = pnand %p628_p2, %p622_p13 }
 0x260   : > { %632 = shalt.err (!%p629_p5)
}
 0x261   : > { %s633_s26 = scalar_lea.hbm %s874_s2, 16 }
 0x262   : > { %p634_p7 = scmp.ne.s32.totalorder %s874_s2, %s633_s26  ;;  %p639_p6 = scmp.lt.u32.totalorder %s633_s26, %s874_s2 }
 0x264   : > { %p635_p9 = pnand %p634_p7, %p837_p10 }
 0x266   : > { %p636_p8 = pneg %p635_p9 }
 0x268   : > { %p641_p4 = pnand %p639_p6, %p636_p8 }
 0x26a   : > { %644 = shalt.err (!%p641_p4)
}
 0x26b   : > { %507 = dma.vmem_to_hbm [thread:$0]  (%p837_p10), %s414_s22, 16, %s874_s2, [#allocation7]  }
 0x26c   : > { %666 = dma.done.wait (%p837_p10), [#allocation7], 16  }
 0x26d   : > { %668 = vsyncadd (%p837_p10), [#allocation7], 4294967280 }
 0x26e PF: > { %s15_s11 = sadd.s32 1, %s679_s11   ;;  %s884_s9 = smov %s675_s10 }
 0x26f   : > { %p12_p3 = scmp.ge.s32.totalorder %s15_s11, 4   ;;  %s885_s10 = smov %s887_s13 }
 0x271   :  { %14 = sbr.rel (!%p12_p3) target bundleno = 4 (0x4), region = 79 }
 0x278   :  { %426 = vsyncpa [#allocation6], 1 }
 0x279   :  { %428 = vsyncpa [#allocation6 + $0x1], 1 }
 0x27a   :  { %429 = vsyncpa [#allocation9], 1 }
 0x27b   :  { %430 = vsyncpa [#allocation7], 1 }
 0x27c   :  { %432 = vsyncpa [#allocation7 + $0x1], 1 }

</bundles_post_ra>
